<compile_context>
chip_gen: v5e
topology: v5e:2x2
jax: 0.10.0
libtpu: 0.0.40
codegen_flags: <defaults>
</compile_context>

<pallas_src>
import numpy as np
import jax
import jax.numpy as jnp
from jax.experimental import pallas as pl
from jax.experimental.pallas import tpu as pltpu

# ----------------------------- model constants ------------------------------
V = 256            # number of mesh vertices (small synthetic mesh)
NJ = 5             # FLAME joints: global, neck, jaw, eye_l, eye_r
NJ_PAD = 8         # joints padded to 8 for sublane alignment
N_SHAPE = 8
N_EXP = 8
L = N_SHAPE + N_EXP          # betas dimension (16)
P = 9 * (NJ - 1)             # pose-blend basis dimension (36)
K_BLEND = L + P              # fused blend contraction dim (52)
K_PAD = 64                   # padded contraction dim (clean (8,128) tiles)
PARENTS = [-1, 0, 1, 1, 1]   # FLAME kintree
B = 2


# ================= Pallas kernel: fused blendshapes + LBS skinning ===========
def _flame_lbs_kernel(coeff_ref, vt_ref, basis_ref, a_ref, w_ref,
                      t_ref, verts_ref):
    # coeff_ref: (B, K_PAD)   = [betas | pose_feature | zeros]
    # vt_ref:    (1, 3V)      coordinate-major template ([all x|all y|all z])
    # basis_ref: (K_PAD, 3V)  coordinate-major [shapedirs ; posedirs ; zeros]
    # a_ref:     (B*16, NJ_PAD) joint transforms, column-major flattened 4x4:
    #            row (b*16 + 4k + c) holds A[b, j, c, k] over the joint lane j.
    # w_ref:     (NJ_PAD, V)  skinning weights (joints x vertices, zero-padded)
    # t_ref:     (B*16, V)    per-vertex transforms (lane-dense)
    # verts_ref: (B*3, V)     skinned vertices, coordinate-major (lane-dense)
    b = a_ref.shape[0] // 16
    v = w_ref.shape[1]

    # blendshapes: v_posed = v_template + [betas|pose_feat] @ [shapedirs;posedirs]
    vp = vt_ref[...] + jnp.dot(coeff_ref[...], basis_ref[...],
                               preferred_element_type=jnp.float32)      # (B, 3V)

    # per-vertex transforms for both batch elements in one MXU dot
    T = jnp.dot(a_ref[...], w_ref[...],
                preferred_element_type=jnp.float32)                     # (B*16, V)
    t_ref[...] = T

    # application: column-major row grouping -> broadcast MACs on (3, V) slabs;
    # homogeneous w == 1 so the translation group (rows 12:15) is a plain add.
    # Only the 3 needed rows per group are touched (no homogeneous row).
    for bi in range(b):                       # static unroll (B = 2)
        x = vp[bi:bi + 1, 0 * v:1 * v]        # (1, V)
        y = vp[bi:bi + 1, 1 * v:2 * v]
        z = vp[bi:bi + 1, 2 * v:3 * v]
        Tb = T[bi * 16:(bi + 1) * 16]         # (16, V)
        verts_ref[bi * 3:(bi + 1) * 3, :] = (
            Tb[0:3] * x + Tb[4:7] * y + Tb[8:11] * z + Tb[12:15])


def flame_lbs_pallas(coeff, v_template_coord, blend_basis_coord,
                     a16_flat, lbs_weights_t):
    b = coeff.shape[0]
    kp = blend_basis_coord.shape[0]
    v3 = v_template_coord.shape[1]
    jp, v = lbs_weights_t.shape
    vmem = pltpu.MemorySpace.VMEM
    # Whole problem (<1 MiB resident) fits trivially in VMEM on every
    # generation -> single grid-free step, no pipeline bookkeeping, no
    # per-batch grid loop (one batched MXU dot instead).
    flops = 2 * b * kp * v3 + 2 * (b * 16) * jp * v + 7 * b * 3 * v
    bytes_accessed = 4 * (coeff.size + v_template_coord.size
                          + blend_basis_coord.size + a16_flat.size
                          + lbs_weights_t.size + b * 16 * v + b * 3 * v)
    return pl.pallas_call(
        _flame_lbs_kernel,
        out_shape=(jax.ShapeDtypeStruct((b * 16, v), jnp.float32),
                   jax.ShapeDtypeStruct((b * 3, v), jnp.float32)),
        in_specs=[pl.BlockSpec(memory_space=vmem)] * 5,
        out_specs=(pl.BlockSpec(memory_space=vmem),
                   pl.BlockSpec(memory_space=vmem)),
        cost_estimate=pl.CostEstimate(flops=flops, transcendentals=0,
                                      bytes_accessed=bytes_accessed),
    )(coeff, v_template_coord, blend_basis_coord, a16_flat, lbs_weights_t)


# ============================ small JAX glue (tiny) ==========================
def batch_rodrigues(rot_vecs):
    # rot_vecs: (N, 3) axis-angle -> (N, 3, 3) rotation matrices
    n = rot_vecs.shape[0]
    angle = jnp.linalg.norm(rot_vecs + 1e-8, axis=1, keepdims=True)    # (N,1)
    rot_dir = rot_vecs / angle
    cos = jnp.cos(angle)[:, None]                                      # (N,1,1)
    sin = jnp.sin(angle)[:, None]
    rx, ry, rz = jnp.split(rot_dir, 3, axis=1)
    zeros = jnp.zeros((n, 1), dtype=rot_vecs.dtype)
    K = jnp.concatenate(
        [zeros, -rz, ry, rz, zeros, -rx, -ry, rx, zeros], axis=1
    ).reshape(n, 3, 3)
    ident = jnp.eye(3, dtype=rot_vecs.dtype)[None]
    return ident + sin * K + (1.0 - cos) * jnp.matmul(K, K)


def batch_rigid_transform(rot_mats, joints, parents):
    # rot_mats: (B, J, 3, 3); joints: (B, J, 3)  -> relative joint transforms A
    # TODO(synk): kinematic-chain walk over 5 joints stays in plain JAX (tiny,
    # sequential scalar-scale work; no benefit from a Pallas kernel).
    bsz, nj = rot_mats.shape[:2]
    joints = joints[..., None]                                         # (B,J,3,1)
    rel_joints = joints.at[:, 1:].set(
        joints[:, 1:] - joints[:, jnp.array(parents[1:])])
    bottom = jnp.tile(jnp.array([0., 0., 0., 1.], dtype=rot_mats.dtype)
                      .reshape(1, 1, 1, 4), (bsz, nj, 1, 1))
    transforms_mat = jnp.concatenate(
        [jnp.concatenate([rot_mats, rel_joints], axis=-1), bottom], axis=-2)
    chain = [transforms_mat[:, 0]]
    for i in range(1, nj):
        chain.append(jnp.matmul(chain[parents[i]], transforms_mat[:, i]))
    transforms = jnp.stack(chain, axis=1)                              # (B,J,4,4)
    posed_joints = transforms[:, :, :3, 3]
    joints_h = jnp.concatenate(
        [joints, jnp.zeros((bsz, nj, 1, 1), dtype=rot_mats.dtype)], axis=2)
    tj = jnp.matmul(transforms, joints_h)                              # (B,J,4,1)
    rel_transforms = transforms - jnp.concatenate(
        [jnp.zeros((bsz, nj, 4, 3), dtype=rot_mats.dtype), tj], axis=-1)
    return posed_joints, rel_transforms


# ============================== FLAME forward ================================
def flame_forward(params, shape_params, expression_params=None, pose_params=None):
    bsz = shape_params.shape[0]
    eye_pose = jnp.tile(params["eye_pose"], (bsz, 1))
    neck_pose = jnp.tile(params["neck_pose"], (bsz, 1))
    if expression_params is None:
        betas = shape_params
    else:
        betas = jnp.concatenate([shape_params, expression_params], axis=1)
    if pose_params is None:
        pose_params = jnp.zeros((bsz, 6), dtype=shape_params.dtype)
    full_pose = jnp.concatenate(
        [pose_params[:, :3], neck_pose, pose_params[:, 3:], eye_pose], axis=1)

    rot_mats = batch_rodrigues(full_pose.reshape(-1, 3)).reshape(bsz, NJ, 3, 3)
    pose_feature = (rot_mats[:, 1:] - jnp.eye(3)).reshape(bsz, -1)     # (B, 36)

    # fused blend coefficient, zero-padded to K_PAD (basis rows 52..63 are 0)
    pad = K_PAD - (betas.shape[1] + P)
    coeff = jnp.concatenate(
        [betas, pose_feature, jnp.zeros((bsz, pad), dtype=betas.dtype)], axis=1)

    # joints via the pre-folded regressor: tiny JAX glue (no v_shaped needed)
    Jnt = params["J0"][None] + (betas @ params["JS_mat"]).reshape(bsz, NJ, 3)
    _, A = batch_rigid_transform(rot_mats, Jnt, PARENTS)               # (B,5,4,4)

    # column-major flatten + pad joints: a16[b*16 + 4k + c, j] = A[b, j, c, k]
    # (tiny 160-float transpose+pad; fuses in XLA)
    A16 = jnp.transpose(A, (0, 3, 2, 1)).reshape(bsz, 16, NJ)
    A16 = jnp.pad(A16, ((0, 0), (0, 0), (0, NJ_PAD - NJ)))
    A16 = A16.reshape(bsz * 16, NJ_PAD)                                # (B*16, 8)

    # --- single fused Pallas hot path: blendshapes + LBS skinning -------------
    T_flat, verts_flat = flame_lbs_pallas(
        coeff, params["v_template_coord"], params["blend_basis_coord"],
        A16, params["lbs_weights_t"])

    # Back to PyTorch output conventions only (kernel outputs stay lane-dense;
    # a downstream consumer could take the coordinate-major layout directly).
    T = jnp.transpose(T_flat.reshape(bsz, 4, 4, V), (0, 3, 2, 1))      # (B,V,4,4)
    vertices = jnp.transpose(verts_flat.reshape(bsz, 3, V), (0, 2, 1)) # (B,V,3)
    return vertices, T


# ---------------------- pure-JAX reference (for checking) --------------------
def flame_forward_ref(params, shape_params, expression_params, pose_params):
    bsz = shape_params.shape[0]
    betas = jnp.concatenate([shape_params, expression_params], axis=1)
    full_pose = jnp.concatenate(
        [pose_params[:, :3], jnp.tile(params["neck_pose"], (bsz, 1)),
         pose_params[:, 3:], jnp.tile(params["eye_pose"], (bsz, 1))], axis=1)
    rot_mats = batch_rodrigues(full_pose.reshape(-1, 3)).reshape(bsz, NJ, 3, 3)
    pose_feature = (rot_mats[:, 1:] - jnp.eye(3)).reshape(bsz, -1)
    v_shaped = params["v_template"][None] + jnp.einsum(
        "bl,vcl->bvc", betas, params["shapedirs"])
    v_posed = v_shaped + (pose_feature @ params["posedirs"]).reshape(bsz, V, 3)
    Jnt = jnp.einsum("jv,bvc->bjc", params["J_regressor"], v_shaped)
    _, A = batch_rigid_transform(rot_mats, Jnt, PARENTS)
    T = jnp.einsum("vj,bjrc->bvrc", params["lbs_weights"], A)          # (B,V,4,4)
    vp_h = jnp.concatenate(
        [v_posed, jnp.ones((bsz, V, 1), dtype=v_posed.dtype)], axis=-1)
    verts = jnp.einsum("bvck,bvk->bvc", T[:, :, :3, :], vp_h)
    return verts, T


# ============================ deterministic params ===========================
def make_params(key):
    ks = jax.random.split(key, 8)
    v_template = 0.1 * jax.random.normal(ks[0], (V, 3), dtype=jnp.float32)
    # full FLAME shapedirs has 300 shape + 100 expression components;
    # the module slices [:, :, :n_shape] and [:, :, 300:300+n_exp].
    shapedirs_full = 0.01 * jax.random.normal(ks[1], (V, 3, 400), dtype=jnp.float32)
    shapedirs = jnp.concatenate(
        [shapedirs_full[:, :, :N_SHAPE], shapedirs_full[:, :, 300:300 + N_EXP]],
        axis=2)                                                        # (V,3,L)
    posedirs_raw = 0.01 * jax.random.normal(ks[2], (V, 3, P), dtype=jnp.float32)
    posedirs = posedirs_raw.reshape(-1, P).T                           # (P, V*3)
    J_regressor = jax.nn.softmax(
        jax.random.normal(ks[3], (NJ, V), dtype=jnp.float32), axis=1)
    lbs_weights = jax.nn.softmax(
        jax.random.normal(ks[4], (V, NJ), dtype=jnp.float32), axis=1)

    # ---- static kernel-layout precomputation (done once, not per call) ------
    # coordinate-major bases ([all x | all y | all z]) so the blend result is
    # already the skinning application's layout; contraction dim padded to 64.
    v_template_coord = v_template.T.reshape(1, 3 * V)                  # (1, 3V)
    shapedirs_coord = jnp.transpose(shapedirs, (2, 1, 0)).reshape(L, 3 * V)
    posedirs_coord = jnp.transpose(posedirs_raw, (2, 1, 0)).reshape(P, 3 * V)
    blend_basis_coord = jnp.concatenate(
        [shapedirs_coord, posedirs_coord,
         jnp.zeros((K_PAD - K_BLEND, 3 * V), dtype=jnp.float32)],
        axis=0)                                                        # (64, 3V)
    # joint regressor folded into the shape basis: joints = J0 + betas @ JS_mat
    J0 = J_regressor @ v_template                                      # (NJ, 3)
    JS = jnp.einsum("jv,vcl->jcl", J_regressor, shapedirs)             # (NJ,3,L)
    JS_mat = JS.reshape(NJ * 3, L).T                                   # (L, NJ*3)
    # skinning weights transposed + zero-padded once
    lbs_weights_t = jnp.pad(lbs_weights.T, ((0, NJ_PAD - NJ), (0, 0))) # (8, V)

    return {
        # canonical (reference) tensors
        "v_template": v_template,
        "shapedirs": shapedirs,
        "posedirs": posedirs,
        "J_regressor": J_regressor,
        "lbs_weights": lbs_weights,
        "eye_pose": jnp.zeros((1, 6), dtype=jnp.float32),
        "neck_pose": jnp.zeros((1, 3), dtype=jnp.float32),
        # kernel-layout tensors
        "v_template_coord": v_template_coord,
        "blend_basis_coord": blend_basis_coord,
        "J0": J0,
        "JS_mat": JS_mat,
        "lbs_weights_t": lbs_weights_t,
    }


if __name__ == "__main__":
    key = jax.random.PRNGKey(0)
    kp, k1, k2, k3 = jax.random.split(key, 4)
    params = make_params(kp)

    shape_params = 0.1 * jax.random.normal(k1, (B, N_SHAPE), dtype=jnp.float32)
    expression_params = 0.1 * jax.random.normal(k2, (B, N_EXP), dtype=jnp.float32)
    pose_params = 0.1 * jax.random.normal(k3, (B, 6), dtype=jnp.float32)

    fwd = jax.jit(flame_forward)
    vertices, T = fwd(params, shape_params, expression_params, pose_params)
    jax.block_until_ready((vertices, T))

    v_ref, T_ref = flame_forward_ref(params, shape_params, expression_params,
                                     pose_params)
    assert vertices.shape == (B, V, 3) and T.shape == (B, V, 4, 4)
    np.testing.assert_allclose(np.asarray(vertices), np.asarray(v_ref),
                               rtol=1e-4, atol=1e-5)
    np.testing.assert_allclose(np.asarray(T), np.asarray(T_ref),
                               rtol=1e-4, atol=1e-5)
    print("KERNEL_OK")
</pallas_src>

<mosaic_0001>
module attributes {stable_mosaic.version = 11 : i64} {
  func.func @_flame_lbs_kernel(%arg0: memref<2x64xf32, #tpu.memory_space<vmem>>, %arg1: memref<1x768xf32, #tpu.memory_space<vmem>>, %arg2: memref<64x768xf32, #tpu.memory_space<vmem>>, %arg3: memref<32x8xf32, #tpu.memory_space<vmem>>, %arg4: memref<8x256xf32, #tpu.memory_space<vmem>>, %arg5: memref<32x256xf32, #tpu.memory_space<vmem>>, %arg6: memref<6x256xf32, #tpu.memory_space<vmem>>) attributes {dimension_semantics = [], scalar_prefetch = 0 : i64, scratch_operands = 0 : i64, tpu.core_type = #tpu.core_type<tc>} {
    %c0 = arith.constant 0 : index
    %c0_0 = arith.constant 0 : index
    %0 = vector.load %arg1[%c0, %c0_0] : memref<1x768xf32, #tpu.memory_space<vmem>>, vector<1x768xf32>
    %c0_1 = arith.constant 0 : index
    %c0_2 = arith.constant 0 : index
    %1 = vector.load %arg0[%c0_1, %c0_2] : memref<2x64xf32, #tpu.memory_space<vmem>>, vector<2x64xf32>
    %c0_3 = arith.constant 0 : index
    %c0_4 = arith.constant 0 : index
    %2 = vector.load %arg2[%c0_3, %c0_4] : memref<64x768xf32, #tpu.memory_space<vmem>>, vector<64x768xf32>
    %cst = arith.constant dense<0.000000e+00> : vector<2x768xf32>
    %3 = tpu.matmul %1, %2, %cst {dimension_numbers = #tpu.dot_dimension_numbers<[1], [0], [0], [1], [0, 0, 1, 1], [], []>} : vector<2x64xf32>, vector<64x768xf32>, vector<2x768xf32> -> vector<2x768xf32>
    %4 = vector.broadcast %0 : vector<1x768xf32> to vector<2x768xf32>
    %5 = arith.addf %4, %3 : vector<2x768xf32>
    %c0_5 = arith.constant 0 : index
    %c0_6 = arith.constant 0 : index
    %6 = vector.load %arg3[%c0_5, %c0_6] : memref<32x8xf32, #tpu.memory_space<vmem>>, vector<32x8xf32>
    %c0_7 = arith.constant 0 : index
    %c0_8 = arith.constant 0 : index
    %7 = vector.load %arg4[%c0_7, %c0_8] : memref<8x256xf32, #tpu.memory_space<vmem>>, vector<8x256xf32>
    %cst_9 = arith.constant dense<0.000000e+00> : vector<32x256xf32>
    %8 = tpu.matmul %6, %7, %cst_9 {dimension_numbers = #tpu.dot_dimension_numbers<[1], [0], [0], [1], [0, 0, 1, 1], [], []>} : vector<32x8xf32>, vector<8x256xf32>, vector<32x256xf32> -> vector<32x256xf32>
    %c0_10 = arith.constant 0 : index
    %c0_11 = arith.constant 0 : index
    %9 = vector.load %arg5[%c0_10, %c0_11] : memref<32x256xf32, #tpu.memory_space<vmem>>, vector<32x256xf32>
    tpu.vector_store %arg5[%c0_10, %c0_11], %8 {strides = array<i32>} : memref<32x256xf32, #tpu.memory_space<vmem>>, vector<32x256xf32>,
    %10 = vector.extract_strided_slice %5 {offsets = [0, 0], sizes = [1, 256], strides = [1, 1]} : vector<2x768xf32> to vector<1x256xf32>
    %11 = vector.extract_strided_slice %5 {offsets = [0, 256], sizes = [1, 256], strides = [1, 1]} : vector<2x768xf32> to vector<1x256xf32>
    %12 = vector.extract_strided_slice %5 {offsets = [0, 512], sizes = [1, 256], strides = [1, 1]} : vector<2x768xf32> to vector<1x256xf32>
    %13 = vector.extract_strided_slice %8 {offsets = [0, 0], sizes = [16, 256], strides = [1, 1]} : vector<32x256xf32> to vector<16x256xf32>
    %14 = vector.extract_strided_slice %13 {offsets = [0, 0], sizes = [3, 256], strides = [1, 1]} : vector<16x256xf32> to vector<3x256xf32>
    %15 = vector.broadcast %10 : vector<1x256xf32> to vector<3x256xf32>
    %16 = arith.mulf %14, %15 : vector<3x256xf32>
    %17 = vector.extract_strided_slice %13 {offsets = [4, 0], sizes = [3, 256], strides = [1, 1]} : vector<16x256xf32> to vector<3x256xf32>
    %18 = vector.broadcast %11 : vector<1x256xf32> to vector<3x256xf32>
    %19 = arith.mulf %17, %18 : vector<3x256xf32>
    %20 = arith.addf %16, %19 : vector<3x256xf32>
    %21 = vector.extract_strided_slice %13 {offsets = [8, 0], sizes = [3, 256], strides = [1, 1]} : vector<16x256xf32> to vector<3x256xf32>
    %22 = vector.broadcast %12 : vector<1x256xf32> to vector<3x256xf32>
    %23 = arith.mulf %21, %22 : vector<3x256xf32>
    %24 = arith.addf %20, %23 : vector<3x256xf32>
    %25 = vector.extract_strided_slice %13 {offsets = [12, 0], sizes = [3, 256], strides = [1, 1]} : vector<16x256xf32> to vector<3x256xf32>
    %26 = arith.addf %24, %25 : vector<3x256xf32>
    %c0_12 = arith.constant 0 : index
    %c0_13 = arith.constant 0 : index
    %27 = vector.load %arg6[%c0_12, %c0_13] : memref<6x256xf32, #tpu.memory_space<vmem>>, vector<3x256xf32>
    tpu.vector_store %arg6[%c0_12, %c0_13], %26 {strides = array<i32>} : memref<6x256xf32, #tpu.memory_space<vmem>>, vector<3x256xf32>,
    %28 = vector.extract_strided_slice %5 {offsets = [1, 0], sizes = [1, 256], strides = [1, 1]} : vector<2x768xf32> to vector<1x256xf32>
    %29 = vector.extract_strided_slice %5 {offsets = [1, 256], sizes = [1, 256], strides = [1, 1]} : vector<2x768xf32> to vector<1x256xf32>
    %30 = vector.extract_strided_slice %5 {offsets = [1, 512], sizes = [1, 256], strides = [1, 1]} : vector<2x768xf32> to vector<1x256xf32>
    %31 = vector.extract_strided_slice %8 {offsets = [16, 0], sizes = [16, 256], strides = [1, 1]} : vector<32x256xf32> to vector<16x256xf32>
    %32 = vector.extract_strided_slice %31 {offsets = [0, 0], sizes = [3, 256], strides = [1, 1]} : vector<16x256xf32> to vector<3x256xf32>
    %33 = vector.broadcast %28 : vector<1x256xf32> to vector<3x256xf32>
    %34 = arith.mulf %32, %33 : vector<3x256xf32>
    %35 = vector.extract_strided_slice %31 {offsets = [4, 0], sizes = [3, 256], strides = [1, 1]} : vector<16x256xf32> to vector<3x256xf32>
    %36 = vector.broadcast %29 : vector<1x256xf32> to vector<3x256xf32>
    %37 = arith.mulf %35, %36 : vector<3x256xf32>
    %38 = arith.addf %34, %37 : vector<3x256xf32>
    %39 = vector.extract_strided_slice %31 {offsets = [8, 0], sizes = [3, 256], strides = [1, 1]} : vector<16x256xf32> to vector<3x256xf32>
    %40 = vector.broadcast %30 : vector<1x256xf32> to vector<3x256xf32>
    %41 = arith.mulf %39, %40 : vector<3x256xf32>
    %42 = arith.addf %38, %41 : vector<3x256xf32>
    %43 = vector.extract_strided_slice %31 {offsets = [12, 0], sizes = [3, 256], strides = [1, 1]} : vector<16x256xf32> to vector<3x256xf32>
    %44 = arith.addf %42, %43 : vector<3x256xf32>
    %c3 = arith.constant 3 : index
    %c0_14 = arith.constant 0 : index
    %45 = vector.load %arg6[%c3, %c0_14] : memref<6x256xf32, #tpu.memory_space<vmem>>, vector<3x256xf32>
    tpu.vector_store %arg6[%c3, %c0_14], %44 {strides = array<i32>} : memref<6x256xf32, #tpu.memory_space<vmem>>, vector<3x256xf32>,
    return
  }
}

</mosaic_0001>

<bundles_post_ra>
// kernel: flame_forward.1
= control target key start
LH: loop header
LB: loop body
LE: loop exit
PB: predicated region body
PF: predicated region fallthrough
CT: control target
= control target key end

     0   :  { %vm72_vm0 = vcmask 523264   ;;  %vm221_vm1 = vcmask 64512   ;;  %s657_s2 = inlined_call_operand.vmem [shape: f32[64,768], index: 2, kind: input, shape index: {}]   ;;  %s658_s0 = inlined_call_operand.vmem [shape: f32[2,64], index: 0, kind: input, shape index: {}]   ;;  %s659_s4 = inlined_call_operand.vmem [shape: f32[8,256], index: 4, kind: input, shape index: {}]   ;;  %s660_s3 = inlined_call_operand.vmem [shape: f32[32,8], index: 3, kind: input, shape index: {}]   ;;  %s661_s1 = inlined_call_operand.vmem [shape: f32[1,768], index: 1, kind: input, shape index: {}]   ;;  %s662_s5 = inlined_call_operand.vmem [shape: f32[32,256], index: 5, kind: output, shape index: {0}]   ;;  %s663_s6 = inlined_call_operand.vmem [shape: f32[6,256], index: 6, kind: output, shape index: {1}]  }
   0x1   :  { %v66_v0 = vld [vmem:[%s657_s2 + $0x150] sm:$0xff]  ;;  %v67_v1 = vld [vmem:[%s657_s2 + $0x158] sm:$0xff]  ;;  %v68_v2 = vld [vmem:[%s657_s2 + $0x160] sm:$0xff] }
   0x2   :  { %84 = vmatpush.msra.mxu0 %v66_v0  ;;  %104 = vmatpush.msra.mxu1 %v67_v1  ;;  %v69_v3 = vld [vmem:[%s657_s2 + $0x168] sm:$0xff]  ;;  %v60_v4 = vld [vmem:[%s657_s2 + $0x120] sm:$0xff]  ;;  %v62_v6 = vld [vmem:[%s657_s2 + $0x130] sm:$0xff] }
   0x3   :  { %v61_v5 = vld [vmem:[%s657_s2 + $0x128] sm:$0xff]  ;;  %124 = vmatpush.msra.mxu2 %v68_v2  ;;  %144 = vmatpush.msra.mxu3 %v69_v3  ;;  %v63_v7 = vld [vmem:[%s657_s2 + $0x138] sm:$0xff]  ;;  %v54_v8 = vld [vmem:[%s657_s2 + $0xf0] sm:$0xff] }
   0x4   :  { %85 = vmatpush.msra.mxu0 %v60_v4  ;;  %105 = vmatpush.msra.mxu1 %v61_v5  ;;  %v55_v9 = vld [vmem:[%s657_s2 + $0xf8] sm:$0xff]  ;;  %v56_v10 = vld [vmem:[%s657_s2 + $0x100] sm:$0xff]  ;;  %v57_v11 = vld [vmem:[%s657_s2 + $0x108] sm:$0xff] }
   0x5   :  { %125 = vmatpush.msra.mxu2 %v62_v6  ;;  %145 = vmatpush.msra.mxu3 %v63_v7  ;;  %v48_v12 = vld [vmem:[%s657_s2 + $0xc0] sm:$0xff]  ;;  %v49_v13 = vld [vmem:[%s657_s2 + $0xc8] sm:$0xff]  ;;  %v50_v14 = vld [vmem:[%s657_s2 + $0xd0] sm:$0xff] }
   0x6   :  { %86 = vmatpush.msra.mxu0 %v54_v8  ;;  %106 = vmatpush.msra.mxu1 %v55_v9  ;;  %v51_v15 = vld [vmem:[%s657_s2 + $0xd8] sm:$0xff]  ;;  %v42_v16 = vld [vmem:[%s657_s2 + $0x90] sm:$0xff]  ;;  %v44_v18 = vld [vmem:[%s657_s2 + $0xa0] sm:$0xff] }
   0x7   :  { %126 = vmatpush.msra.mxu2 %v56_v10  ;;  %146 = vmatpush.msra.mxu3 %v57_v11  ;;  %v43_v17 = vld [vmem:[%s657_s2 + $0x98] sm:$0xff]  ;;  %v45_v19 = vld [vmem:[%s657_s2 + $0xa8] sm:$0xff]  ;;  %v36_v20 = vld [vmem:[%s657_s2 + $0x60] sm:$0xff] }
   0x8   :  { %87 = vmatpush.msra.mxu0 %v48_v12  ;;  %107 = vmatpush.msra.mxu1 %v49_v13  ;;  %v37_v21 = vld [vmem:[%s657_s2 + $0x68] sm:$0xff]  ;;  %v38_v22 = vld [vmem:[%s657_s2 + $0x70] sm:$0xff]  ;;  %v39_v23 = vld [vmem:[%s657_s2 + $0x78] sm:$0xff] }
   0x9   :  { %127 = vmatpush.msra.mxu2 %v50_v14  ;;  %147 = vmatpush.msra.mxu3 %v51_v15  ;;  %v30_v24 = vld [vmem:[%s657_s2 + $0x30] sm:$0xff]  ;;  %v31_v25 = vld [vmem:[%s657_s2 + $0x38] sm:$0xff]  ;;  %v32_v26 = vld [vmem:[%s657_s2 + $0x40] sm:$0xff] }
   0xa   :  { %88 = vmatpush.msra.mxu0 %v42_v16  ;;  %108 = vmatpush.msra.mxu1 %v43_v17  ;;  %v33_v27 = vld [vmem:[%s657_s2 + $0x48] sm:$0xff]  ;;  %v24_v28 = vld [vmem:[%s657_s2] sm:$0xff]  ;;  %v26_v30 = vld [vmem:[%s657_s2 + $0x10] sm:$0xff] }
   0xb   :  { %128 = vmatpush.msra.mxu2 %v44_v18  ;;  %148 = vmatpush.msra.mxu3 %v45_v19  ;;  %v25_v29 = vld [vmem:[%s657_s2 + $0x8] sm:$0xff]  ;;  %v27_v31 = vld [vmem:[%s657_s2 + $0x18] sm:$0xff]  ;;  %v23_v32 = vld [vmem:[%s658_s0] sm:$0x3] }
   0xc   :  { %89 = vmatpush.msra.mxu0 %v36_v20  ;;  %109 = vmatpush.msra.mxu1 %v37_v21  ;;  %v70_v33 = vld [vmem:[%s657_s2 + $0x170] sm:$0xff]  ;;  %v71_v34 = vld [vmem:[%s657_s2 + $0x178] sm:$0xff]  ;;  %v219_v35 = vld [vmem:[%s659_s4] sm:$0xff] }
   0xd   :  { %129 = vmatpush.msra.mxu2 %v38_v22  ;;  %149 = vmatpush.msra.mxu3 %v39_v23  ;;  %v220_v36 = vld [vmem:[%s659_s4 + $0x8] sm:$0xff]  ;;  %v64_v37 = vld [vmem:[%s657_s2 + $0x140] sm:$0xff]  ;;  %v58_v39 = vld [vmem:[%s657_s2 + $0x110] sm:$0xff] }
   0xe   :  { %90 = vmatpush.msra.mxu0 %v30_v24  ;;  %110 = vmatpush.msra.mxu1 %v31_v25  ;;  %v65_v38 = vld [vmem:[%s657_s2 + $0x148] sm:$0xff]  ;;  %v59_v40 = vld [vmem:[%s657_s2 + $0x118] sm:$0xff]  ;;  %v52_v41 = vld [vmem:[%s657_s2 + $0xe0] sm:$0xff] }
   0xf   :  { %130 = vmatpush.msra.mxu2 %v32_v26  ;;  %150 = vmatpush.msra.mxu3 %v33_v27  ;;  %v53_v42 = vld [vmem:[%s657_s2 + $0xe8] sm:$0xff]  ;;  %v46_v44 = vld [vmem:[%s657_s2 + $0xb0] sm:$0xff]  ;;  %v47_v45 = vld [vmem:[%s657_s2 + $0xb8] sm:$0xff] }
  0x10   :  { %91 = vmatpush.msra.mxu0 %v24_v28  ;;  %111 = vmatpush.msra.mxu1 %v25_v29  ;;  %v216_v43 = vld [vmem:[%s660_s3 + $0x8] sm:$0xff]  ;;  %v40_v46 = vld [vmem:[%s657_s2 + $0x80] sm:$0xff]  ;;  %v34_v48 = vld [vmem:[%s657_s2 + $0x50] sm:$0xff] }
  0x11   :  { %131 = vmatpush.msra.mxu2 %v26_v30  ;;  %151 = vmatpush.msra.mxu3 %v27_v31  ;;  %v41_v47 = vld [vmem:[%s657_s2 + $0x88] sm:$0xff]  ;;  %v35_v49 = vld [vmem:[%s657_s2 + $0x58] sm:$0xff]  ;;  %v28_v50 = vld [vmem:[%s657_s2 + $0x20] sm:$0xff] }
  0x12   :  { %380 = vmatmul.msk.f32.vlgmr.msra.gmra.mxu2 %vm72_vm0, %v23_v32  ;;  %381 = vmatmul.msk.f32.vlgmr.msra.gmra.mxu3 %vm72_vm0, %v23_v32  ;;  %v29_v51 = vld [vmem:[%s657_s2 + $0x28] sm:$0xff]  ;;  %v217_v52 = vld [vmem:[%s660_s3 + $0x10] sm:$0xff]  ;;  %v215_v53 = vld [vmem:[%s660_s3] sm:$0xff] }
  0x13   :  { %164 = vmatpush.msrb.mxu0 %v70_v33  ;;  %184 = vmatpush.msrb.mxu1 %v71_v34  ;;  %v218_v54 = vld [vmem:[%s660_s3 + $0x18] sm:$0xff]  ;;  %v22_v59 = vld [vmem:[%s661_s1] sm:$0x3f] }
  0x14   :  { %392 = vmatpush.msrb.mxu2 %v219_v35  ;;  %393 = vmatpush.msrb.mxu3 %v220_v36  ;;  %v199_v60 = vperm.slane %v22_v59, 2  ;;  %v200_v61 = vperm.slane %v22_v59, 3  ;;  %v197_v0 = vperm.slane %v22_v59, 0  ;;  %v198_v1 = vperm.slane %v22_v59, 1 }
  0x15   :  { %165 = vmatpush.msrb.mxu0 %v64_v37  ;;  %185 = vmatpush.msrb.mxu1 %v65_v38  ;;  %v201_v4 = vperm.slane %v22_v59, 4  ;;  %v202_v5 = vperm.slane %v22_v59, 5 }
  0x16   :  { %378 = vmatmul.msk.f32.vlgmr.msra.gmra.mxu0 %vm72_vm0, %v23_v32  ;;  %379 = vmatmul.msk.f32.vlgmr.msra.gmra.mxu1 %vm72_vm0, %v23_v32 }
  0x17   :  { %166 = vmatpush.msrb.mxu0 %v58_v39  ;;  %186 = vmatpush.msrb.mxu1 %v59_v40 }
  0x19   :  { %167 = vmatpush.msrb.mxu0 %v52_v41  ;;  %187 = vmatpush.msrb.mxu1 %v53_v42 }
  0x1a   :  { %385 = vmatmul.msk.f32.vlgmr.msrb.gmra.mxu2 %vm221_vm1, %v216_v43  ;;  %389 = vmatmul.msk.f32.vlgmr.msrb.gmra.mxu3 %vm221_vm1, %v216_v43 }
  0x1b   :  { %168 = vmatpush.msrb.mxu0 %v46_v44  ;;  %188 = vmatpush.msrb.mxu1 %v47_v45 }
  0x1d   :  { %169 = vmatpush.msrb.mxu0 %v40_v46  ;;  %189 = vmatpush.msrb.mxu1 %v41_v47 }
  0x1f   :  { %170 = vmatpush.msrb.mxu0 %v34_v48  ;;  %190 = vmatpush.msrb.mxu1 %v35_v49 }
  0x21   :  { %171 = vmatpush.msrb.mxu0 %v28_v50  ;;  %191 = vmatpush.msrb.mxu1 %v29_v51 }
  0x22   :  { %382 = vmatmul.msk.f32.vlgmr.msrb.gmra.mxu0 %vm72_vm0, %v23_v32  ;;  %383 = vmatmul.msk.f32.vlgmr.msrb.gmra.mxu1 %vm72_vm0, %v23_v32 }
  0x23   :  { %386 = vmatmul.msk.f32.gmra.mxu2 %vm221_vm1, %v217_v52  ;;  %390 = vmatmul.msk.f32.gmra.mxu3 %vm221_vm1, %v217_v52 }
  0x24   :  { %249 = vmatpush.msra.mxu0 %v219_v35  ;;  %278 = vmatpush.msra.mxu1 %v220_v36 }
  0x2a   :  { %384 = vmatmul.msk.f32.vlgmr.msra.gmra.mxu0 %vm221_vm1, %v215_v53  ;;  %388 = vmatmul.msk.f32.vlgmr.msra.gmra.mxu1 %vm221_vm1, %v215_v53 }
  0x2b   :  { %387 = vmatmul.msk.f32.gmra.mxu2 %vm221_vm1, %v218_v54  ;;  %391 = vmatmul.msk.f32.gmra.mxu3 %vm221_vm1, %v218_v54 }
  0x93   :  { %v93_v55 = vpop.f32.mrf.mxu0  ;;  %v113_v56 = vpop.f32.mrf.mxu1 }
  0x94   :  { %v209_v8 = vadd.f32 %v197_v0, %v93_v55  ;;  %v210_v9 = vadd.f32 %v198_v1, %v113_v56 }
  0x95   :  { %v133_v57 = vpop.f32.mrf.mxu2  ;;  %v153_v58 = vpop.f32.mrf.mxu3 }
  0x96   :  { %v211_v6 = vadd.f32 %v199_v60, %v133_v57  ;;  %v212_v7 = vadd.f32 %v200_v61, %v153_v58  ;;  %v300_v18 = vperm.slane %v209_v8, 0  ;;  %v301_v19 = vperm.slane %v210_v9, 0 }
  0x97   :  { %v332_v32 = vperm.slane %v209_v8, 1  ;;  %v333_v33 = vperm.slane %v210_v9, 1 }
  0x98   :  { %v336_v12 = vperm.slane %v211_v6, 1  ;;  %v337_v13 = vperm.slane %v212_v7, 1  ;;  %v304_v14 = vperm.slane %v211_v6, 0  ;;  %v305_v15 = vperm.slane %v212_v7, 0 }
  0x9d   :  { %v611_v62 = vpop.f32.mrf.mxu2  ;;  %v613_v63 = vpop.f32.mrf.mxu3 }
  0x9e   :  { %294 = vst [vmem:[%s662_s5 + $0x10] sm:$0xff] %v611_v62  ;;  %v324_v44 = vrot.slane %v611_v62, 4  ;;  %v325_v45 = vrot.slane %v613_v63, 4 }
  0x9f   :  { %295 = vst [vmem:[%s662_s5 + $0x18] sm:$0xff] %v613_v63  ;;  %v173_v2 = vpop.f32.mrf.mxu0  ;;  %v193_v3 = vpop.f32.mrf.mxu1 }
  0xa0   :  { %v213_v10 = vadd.f32 %v201_v4, %v173_v2  ;;  %v214_v11 = vadd.f32 %v202_v5, %v193_v3 }
  0xa2   :  { %v316_v24 = vperm.slane %v213_v10, 0  ;;  %v317_v25 = vperm.slane %v214_v11, 0  ;;  %v348_v40 = vperm.slane %v213_v10, 1  ;;  %v349_v41 = vperm.slane %v214_v11, 1 }
  0xa4   :  { %v318_v36 = vmul.f32 %v316_v24, %v611_v62  ;;  %v319_v37 = vmul.f32 %v317_v25, %v613_v63 }
  0xa6   :  { %v257_v16 = vpop.f32.mrf.mxu2  ;;  %v286_v17 = vpop.f32.mrf.mxu3 }
  0xa7   :  { %296 = vst [vmem:[%s662_s5 + $0x20] sm:$0xff] %v257_v16  ;;  %v338_v20 = vmul.f32 %v336_v12, %v257_v16  ;;  %v339_v21 = vmul.f32 %v337_v13, %v286_v17  ;;  %v251_v22 = vpop.f32.mrf.mxu0  ;;  %v280_v23 = vpop.f32.mrf.mxu1  ;;  %v334_v42 = vmul.f32 %v332_v32, %v257_v16  ;;  %v335_v43 = vmul.f32 %v333_v33, %v286_v17 }
  0xa8   :  { %297 = vst [vmem:[%s662_s5 + $0x28] sm:$0xff] %v286_v17  ;;  %v306_v26 = vmul.f32 %v304_v14, %v251_v22  ;;  %v307_v27 = vmul.f32 %v305_v15, %v280_v23  ;;  %v302_v28 = vmul.f32 %v300_v18, %v251_v22  ;;  %v303_v30 = vmul.f32 %v301_v19, %v280_v23 }
  0xa9   :  { %292 = vst [vmem:[%s662_s5] sm:$0xff] %v251_v22  ;;  %v342_v34 = vrot.slane %v338_v20, 4  ;;  %v343_v35 = vrot.slane %v339_v21, 4 }
  0xaa   :  { %v310_v29 = vrot.slane %v306_v26, 4  ;;  %293 = vst [vmem:[%s662_s5 + $0x8] sm:$0xff] %v280_v23  ;;  %v311_v31 = vrot.slane %v307_v27, 4 }
  0xab   :  { %v346_v50 = vadd.f32 %v342_v34, %v334_v42  ;;  %v347_v51 = vadd.f32 %v343_v35, %v335_v43 }
  0xac   :  { %v314_v38 = vadd.f32 %v310_v29, %v302_v28  ;;  %v315_v39 = vadd.f32 %v311_v31, %v303_v30 }
  0xae   :  { %v320_v46 = vadd.f32 %v318_v36, %v314_v38  ;;  %v321_v47 = vadd.f32 %v319_v37, %v315_v39  ;;  %v260_v48 = vpop.f32.mrf.mxu2  ;;  %v289_v49 = vpop.f32.mrf.mxu3 }
  0xaf   :  { %298 = vst [vmem:[%s662_s5 + $0x30] sm:$0xff] %v260_v48  ;;  %v350_v52 = vmul.f32 %v348_v40, %v260_v48  ;;  %v351_v53 = vmul.f32 %v349_v41, %v289_v49  ;;  %v356_v57 = vrot.slane %v260_v48, 4  ;;  %v357_v59 = vrot.slane %v289_v49, 4 }
  0xb0   :  { %v328_v54 = vadd.f32 %v324_v44, %v320_v46  ;;  %v329_v55 = vadd.f32 %v325_v45, %v321_v47  ;;  %299 = vst [vmem:[%s662_s5 + $0x38] sm:$0xff] %v289_v49 }
  0xb1   :  { %v352_v56 = vadd.f32 %v350_v52, %v346_v50  ;;  %v353_v58 = vadd.f32 %v351_v53, %v347_v51 }
  0xb2   :  { %330 = vst [vmem:[%s663_s6] sm:$0x7] %v328_v54 }
  0xb3   :  { %331 = vst [vmem:[%s663_s6 + $0x8] sm:$0x7] %v329_v55  ;;  %v360_v60 = vadd.f32 %v356_v57, %v352_v56  ;;  %v361_v61 = vadd.f32 %v357_v59, %v353_v58 }
  0xb5   :  { %v364_v62 = vrot.slane %v360_v60, 5  ;;  %v365_v63 = vrot.slane %v361_v61, 5 }
  0xb7   :  { %368 = vst [vmem:[%s663_s6] sm:$0x38] %v364_v62 }
  0xb8   :  { %369 = vst [vmem:[%s663_s6 + $0x8] sm:$0x38] %v365_v63 }

</bundles_post_ra>
